<compile_context>
chip_gen: v7x
topology: tpu7x:2x2x1
jax: 0.10.0
libtpu: 0.0.40
codegen_flags: <defaults>
</compile_context>

<pallas_src>
import functools
import numpy as np
import jax
import jax.numpy as jnp
from jax import lax
from jax.experimental import pallas as pl
from jax.experimental.pallas import tpu as pltpu


# =====================================================================
# Sizing
# =====================================================================
try:
    _VMEM_CAP = int(pltpu.get_tpu_info().vmem_capacity_bytes)
except Exception:                                    # interpret mode / older jax
    _VMEM_CAP = 64 * 1024 * 1024
_VMEM_LIMIT = int(min(max(_VMEM_CAP - 16 * 1024 * 1024, 32 * 1024 * 1024),
                      100 * 1024 * 1024))

_LIN_TILE_M = 1024        # rows per linear tile (K, N <= ~512 -> few MiB footprint)
_ATTN_TILE = 512          # graph-attention node tile (multiple of 128)
_CONV_TILE_N = 256        # nodes per tile for the fused conv-stack kernels

_MASK_VAL = -1e30
_M_INIT = -1e29


def _round_up(x, m):
    return ((x + m - 1) // m) * m


def _pad_rows(x, target):
    if x.shape[0] == target:
        return x
    pad = [(0, target - x.shape[0])] + [(0, 0)] * (x.ndim - 1)
    return jnp.pad(x, pad)


def _fit_rows(x, rows):
    if x.shape[0] == rows:
        return x
    if x.shape[0] > rows:
        return x[:rows]
    return _pad_rows(x, rows)


def _cparams(sem):
    return pltpu.CompilerParams(dimension_semantics=sem,
                                vmem_limit_bytes=_VMEM_LIMIT)


# =====================================================================
# Linear (bf16 MXU, f32 epilogue, lane-dense output)
# =====================================================================

def _linear_kernel(x_ref, w_ref, b_ref, o_ref, *, activation):
    y = jnp.dot(x_ref[...].astype(jnp.bfloat16), w_ref[...],
                preferred_element_type=jnp.float32) + b_ref[...]
    if activation == "relu":
        y = jnp.maximum(y, 0.0)
    elif activation == "celu":                        # F.celu, alpha = 1
        y = jnp.where(y > 0.0, y, jnp.exp(jnp.minimum(y, 0.0)) - 1.0)
    o_ref[...] = y


def make_linear(w, b):
    """Pre-pad weight lanes to a multiple of 128 and pre-cast to bf16 (once, at init)."""
    K, N = w.shape
    Np = _round_up(N, 128)
    return {"w": jnp.pad(w, ((0, 0), (0, Np - N))).astype(jnp.bfloat16),
            "b": jnp.pad(b.astype(jnp.float32).reshape(1, N), ((0, 0), (0, Np - N))),
            "n_out": int(N)}


def pallas_linear(x, lin, activation="none", keep_pad=False):
    M, K = x.shape
    wp, bp = lin["w"], lin["b"]
    Np = wp.shape[1]
    M8 = _round_up(M, 8)
    tile_m = min(_LIN_TILE_M, M8)
    Mp = _round_up(M8, tile_m)
    xp = _pad_rows(x, Mp)
    out = pl.pallas_call(
        functools.partial(_linear_kernel, activation=activation),
        grid=(Mp // tile_m,),
        in_specs=[pl.BlockSpec((tile_m, K), lambda i: (i, 0)),
                  pl.BlockSpec((K, Np), lambda i: (0, 0)),
                  pl.BlockSpec((1, Np), lambda i: (0, 0))],
        out_specs=pl.BlockSpec((tile_m, Np), lambda i: (i, 0)),
        out_shape=jax.ShapeDtypeStruct((Mp, Np), jnp.float32),
        compiler_params=_cparams(("parallel",)),
    )(xp, wp, bp)
    if keep_pad:                       # padded lanes consumed directly downstream
        return out[:M]
    return out[:M, :lin["n_out"]]


# =====================================================================
# Per-categorical-column MLPs (batched, grid reduction over columns)
# =====================================================================

def _cat_mlp_kernel(e_ref, w_ref, b_ref, o_ref):
    @pl.when(pl.program_id(1) == 0)
    def _():
        o_ref[...] = jnp.zeros_like(o_ref)
    o_ref[...] += (jnp.dot(e_ref[0].astype(jnp.bfloat16), w_ref[0],
                           preferred_element_type=jnp.float32) + b_ref[0])


def pallas_cat_mlp(emb, w, b):
    C, N, F = emb.shape
    M8 = _round_up(N, 8)
    tile_m = min(_LIN_TILE_M, M8)
    Mp = _round_up(M8, tile_m)
    embp = jnp.pad(emb, ((0, 0), (0, Mp - N), (0, 0)))
    out = pl.pallas_call(
        _cat_mlp_kernel,
        grid=(Mp // tile_m, C),
        in_specs=[pl.BlockSpec((1, tile_m, F), lambda i, c: (c, i, 0)),
                  pl.BlockSpec((1, F, F), lambda i, c: (c, 0, 0)),
                  pl.BlockSpec((1, 1, F), lambda i, c: (c, 0, 0))],
        out_specs=pl.BlockSpec((tile_m, F), lambda i, c: (i, 0)),
        out_shape=jax.ShapeDtypeStruct((Mp, F), jnp.float32),
        compiler_params=_cparams(("parallel", "arbitrary")),
    )(embp, w, b)
    return out[:N]


# =====================================================================
# Tabular1DCNN2: fused conv kernels (channels-last, merged (node, L) rows)
# =====================================================================

def _conv1_kernel(x_ref, w_ref, s_ref, t_ref, o_ref, *, L, ksize):
    # x: (tile_n*L, Cin) f32, rows r -> position l = r % L; BN -> conv(k=5) -> ReLU.
    M = x_ref.shape[0]
    pad = (ksize - 1) // 2
    pos = lax.broadcasted_iota(jnp.int32, (M, 1), 0) % L
    xn = x_ref[...] * s_ref[...] + t_ref[...]
    acc = None
    for d in range(ksize):
        off = d - pad
        if off == 0:
            xs = xn
        else:
            valid = (pos + off >= 0) & (pos + off < L)
            xs = jnp.where(valid, pltpu.roll(xn, shift=(-off) % M, axis=0), 0.0)
        part = jnp.dot(xs.astype(jnp.bfloat16), w_ref[d],
                       preferred_element_type=jnp.float32)
        acc = part if acc is None else acc + part
    o_ref[...] = jnp.maximum(acc, 0.0)


def _conv_stack_kernel(x_ref, w_ref, b_ref, s_ref, t_ref, o_ref, *, L, res_flags):
    # 9 fused layers (conv2..conv10), all padded to a common channel width.
    M, _ = x_ref.shape
    pos = lax.broadcasted_iota(jnp.int32, (M, 1), 0) % L
    valid_lo = pos >= 1
    valid_hi = pos <= L - 2
    x = x_ref[...]
    for layer, has_res in enumerate(res_flags):
        xn = x * s_ref[layer] + t_ref[layer]
        acc = jnp.dot(xn.astype(jnp.bfloat16), w_ref[layer, 1],
                      preferred_element_type=jnp.float32)
        xlo = jnp.where(valid_lo, pltpu.roll(xn, shift=1, axis=0), 0.0)
        acc = acc + jnp.dot(xlo.astype(jnp.bfloat16), w_ref[layer, 0],
                            preferred_element_type=jnp.float32)
        xhi = jnp.where(valid_hi, pltpu.roll(xn, shift=M - 1, axis=0), 0.0)
        acc = acc + jnp.dot(xhi.astype(jnp.bfloat16), w_ref[layer, 2],
                            preferred_element_type=jnp.float32)
        y = jnp.maximum(acc + b_ref[layer], 0.0)
        x = y + x if has_res else y          # residual adds the pre-BN input
    o_ref[...] = x


def _call_conv1(x2, p, N, Din, L1, C0):
    tile_n = min(_CONV_TILE_N, N)
    Nt = _round_up(N, tile_n)
    rows_tile = tile_n * L1
    xp = _pad_rows(x2, Nt * L1)
    return pl.pallas_call(
        functools.partial(_conv1_kernel, L=L1, ksize=5),
        grid=(Nt // tile_n,),
        in_specs=[pl.BlockSpec((rows_tile, Din), lambda i: (i, 0)),
                  pl.BlockSpec((5, Din, C0), lambda i: (0, 0, 0)),
                  pl.BlockSpec((1, Din), lambda i: (0, 0)),
                  pl.BlockSpec((1, Din), lambda i: (0, 0))],
        out_specs=pl.BlockSpec((rows_tile, C0), lambda i: (i, 0)),
        out_shape=jax.ShapeDtypeStruct((Nt * L1, C0), jnp.float32),
        compiler_params=_cparams(("parallel",)),
    )(xp, p["conv1_w"], p["bn_cv1_s"], p["bn_cv1_t"])


def _call_conv_stack(x2, p, N, L, C):
    tile_n = min(_CONV_TILE_N, N)
    Nt = _round_up(N, tile_n)
    rows_tile = tile_n * L
    xp = _pad_rows(x2, Nt * L)
    nl = p["stack_w"].shape[0]
    return pl.pallas_call(
        functools.partial(_conv_stack_kernel, L=L, res_flags=p["stack_res"]),
        grid=(Nt // tile_n,),
        in_specs=[pl.BlockSpec((rows_tile, C), lambda i: (i, 0)),
                  pl.BlockSpec((nl, 3, C, C), lambda i: (0, 0, 0, 0)),
                  pl.BlockSpec((nl, 1, C), lambda i: (0, 0, 0)),
                  pl.BlockSpec((nl, 1, C), lambda i: (0, 0, 0)),
                  pl.BlockSpec((nl, 1, C), lambda i: (0, 0, 0))],
        out_specs=pl.BlockSpec((rows_tile, C), lambda i: (i, 0)),
        out_shape=jax.ShapeDtypeStruct((Nt * L, C), jnp.float32),
        compiler_params=_cparams(("parallel",)),
    )(xp, p["stack_w"], p["stack_b"], p["stack_s"], p["stack_t"])


def tabular_cnn_forward(p, x):
    """Tabular1DCNN2.forward (eval). x: (N, Din) -> (N, Din, ED)."""
    N, Din = x.shape
    ED = p["embed_dim"]
    C0 = p["c0"]
    L1 = 2 * ED
    xh = pallas_linear(x, p["dense1"], activation="celu")        # BN1 folded, (N, L1*Din)
    x2 = xh.reshape(N * L1, Din)                                 # channels-last rows
    y = _call_conv1(x2, p, N, Din, L1, C0)[:N * L1]              # conv1 + relu
    # TODO(synk): AdaptiveAvgPool1d + final transpose stay as tiny XLA glue between
    # the two fused conv kernels (adjacent-pair mean / (L,C) swap on a few-KB tensor).
    y = y.reshape(N * ED, 2, C0).mean(axis=1)                    # ave_pool1 -> (N*ED, C0)
    y = _call_conv_stack(y, p, N, ED, C0)[:N * ED, :Din]         # conv2..conv10 fused
    return y.reshape(N, ED, Din).transpose(0, 2, 1)              # (N, Din, ED)


# =====================================================================
# Fused neighbour multi-head attention chain (qkv -> attn -> final -> LN -> mlp)
# =====================================================================

def _neigh_attn_kernel(x_ref, wqkv_ref, bqkv_ref, wfin_ref, bfin_ref,
                       lng_ref, lnb_ref, wmlp_ref, bmlp_ref, o_ref,
                       *, num_heads, head_dim, ln_eps):
    tn, S, F = x_ref.shape
    x2 = x_ref[...].reshape(tn * S, F).astype(jnp.bfloat16)
    qkv = jnp.dot(x2, wqkv_ref[...], preferred_element_type=jnp.float32) + bqkv_ref[...]
    scale = 1.0 / float(np.sqrt(head_dim))
    ctx_pieces = []
    for h in range(num_heads):
        a, bnd = h * head_dim, (h + 1) * head_dim
        qh = qkv[:, a:bnd].reshape(tn, S, head_dim).astype(jnp.bfloat16)
        kh = qkv[:, F + a:F + bnd].reshape(tn, S, head_dim).astype(jnp.bfloat16)
        vh = qkv[:, 2 * F + a:2 * F + bnd].reshape(tn, S, head_dim).astype(jnp.bfloat16)
        s = jnp.einsum("nsd,ntd->nst", qh, kh,
                       preferred_element_type=jnp.float32) * scale
        s = s - jnp.max(s, axis=-1, keepdims=True)
        pr = jnp.exp(s)
        pr = pr / jnp.sum(pr, axis=-1, keepdims=True)
        ctx_pieces.append(jnp.einsum("nst,ntd->nsd", pr.astype(jnp.bfloat16), vh,
                                     preferred_element_type=jnp.float32))
    ctx = jnp.concatenate(ctx_pieces, axis=-1).reshape(tn * S, F)
    hs = jnp.dot(ctx.astype(jnp.bfloat16), wfin_ref[...],
                 preferred_element_type=jnp.float32) + bfin_ref[...]
    mu = jnp.mean(hs, axis=-1, keepdims=True)
    var = jnp.mean((hs - mu) ** 2, axis=-1, keepdims=True)
    hs = (hs - mu) * lax.rsqrt(var + ln_eps) * lng_ref[...] + lnb_ref[...]
    hs3 = hs.reshape(tn, S, F)
    o_ref[...] = jnp.sum(hs3 * wmlp_ref[...], axis=-1) + bmlp_ref[...]


def pallas_neigh_attn(x, p):
    N, S, F = x.shape
    tile_n = min(512, _round_up(N, 8))
    Np = _round_up(_round_up(N, 8), tile_n)
    xp = jnp.pad(x, ((0, Np - N), (0, 0), (0, 0)))
    out = pl.pallas_call(
        functools.partial(_neigh_attn_kernel, num_heads=p["att_heads"],
                          head_dim=F // p["att_heads"], ln_eps=1e-8),
        grid=(Np // tile_n,),
        in_specs=[pl.BlockSpec((tile_n, S, F), lambda i: (i, 0, 0)),
                  pl.BlockSpec((F, 3 * F), lambda i: (0, 0)),
                  pl.BlockSpec((1, 3 * F), lambda i: (0, 0)),
                  pl.BlockSpec((F, F), lambda i: (0, 0)),
                  pl.BlockSpec((1, F), lambda i: (0, 0)),
                  pl.BlockSpec((1, F), lambda i: (0, 0)),
                  pl.BlockSpec((1, F), lambda i: (0, 0)),
                  pl.BlockSpec((1, 1, F), lambda i: (0, 0, 0)),
                  pl.BlockSpec((1, 1), lambda i: (0, 0))],
        out_specs=pl.BlockSpec((tile_n, S), lambda i: (i, 0)),
        out_shape=jax.ShapeDtypeStruct((Np, S), jnp.float32),
        compiler_params=_cparams(("parallel",)),
    )(xp, p["wqkv"], p["bqkv"], p["wfin"], p["bfin"], p["ln_g"], p["ln_b"],
      p["wmlp"], p["bmlp"])
    return out[:N]


# =====================================================================
# Graph TransformerConv: all-heads flash attention + fused epilogue
# =====================================================================

def _graph_conv_kernel(dst_ref, src_ref, adj_ref, ew_ref, es_ref, o_ref,
                       m_sc, l_sc, acc_sc, *, num_heads, head_dim, eps):
    HD = num_heads * head_dim
    j = pl.program_id(1)
    nj = pl.num_programs(1)

    @pl.when(j == 0)
    def _():
        m_sc[...] = jnp.full_like(m_sc, _M_INIT)
        l_sc[...] = jnp.zeros_like(l_sc)
        acc_sc[...] = jnp.zeros_like(acc_sc)

    dst = dst_ref[...]                                   # (td, W) f32 [q|k|v|skip|pad]
    src = src_ref[...]                                   # (ts, W) f32
    kd = dst[:, HD:2 * HD].astype(jnp.bfloat16)
    qs = src[:, :HD].astype(jnp.bfloat16)
    vs = src[:, 2 * HD:3 * HD].astype(jnp.bfloat16)
    neg = jnp.where(adj_ref[...] > 0, 0.0, _MASK_VAL)    # (td, ts)
    scale = 1.0 / float(np.sqrt(head_dim))

    for h in range(num_heads):                           # adjacency read once per tile
        sl = slice(h * head_dim, (h + 1) * head_dim)
        s = lax.dot_general(kd[:, sl], qs[:, sl], (((1,), (1,)), ((), ())),
                            preferred_element_type=jnp.float32) * scale + neg
        m_prev = m_sc[:, h:h + 1]
        m_new = jnp.maximum(m_prev, jnp.max(s, axis=-1, keepdims=True))
        alpha = jnp.exp(m_prev - m_new)
        p = jnp.exp(s - m_new)
        l_sc[:, h:h + 1] = alpha * l_sc[:, h:h + 1] + jnp.sum(p, axis=-1, keepdims=True)
        acc_sc[:, sl] = alpha * acc_sc[:, sl] + jnp.dot(
            p.astype(jnp.bfloat16), vs[:, sl], preferred_element_type=jnp.float32)
        m_sc[:, h:h + 1] = m_new

    @pl.when(j == nj - 1)
    def _():
        pieces = []
        for h in range(num_heads):
            sl = slice(h * head_dim, (h + 1) * head_dim)
            inv = pl.reciprocal(jnp.maximum(l_sc[:, h:h + 1], 1e-20), approx=True)
            pieces.append(acc_sc[:, sl] * inv)           # isolated dst rows -> 0
        rst = jnp.concatenate(pieces, axis=-1)           # (td, HD)
        skip = dst[:, 3 * HD:4 * HD]
        wa, wb = ew_ref[0:1, :], ew_ref[1:2, :]
        lng, lnb = ew_ref[2:3, :], ew_ref[3:4, :]
        gb, pr = es_ref[:, 0:1], es_ref[:, 1:2]
        gl = jnp.sum(skip * wa + rst * wb, axis=-1, keepdims=True) + gb
        gate = 1.0 / (1.0 + jnp.exp(-gl))
        y = gate * skip + (1.0 - gate) * rst
        mu = jnp.mean(y, axis=-1, keepdims=True)
        var = jnp.mean((y - mu) ** 2, axis=-1, keepdims=True)
        y = (y - mu) * lax.rsqrt(var + eps) * lng + lnb
        o_ref[...] = jnp.where(y >= 0.0, y, pr * y)      # PReLU


def pallas_graph_conv(qkvs, adj, ew, es, num_heads, head_dim, eps=1e-5):
    """qkvs: (N, W>=4*H*D) fused [q|k|v|skip] rows; adj[dst, src] != 0 where edge."""
    N = adj.shape[0]
    HD = num_heads * head_dim
    N8 = _round_up(N, 8)
    tile = N8 if N8 <= _ATTN_TILE else _ATTN_TILE
    Np = _round_up(N8, tile)
    q = _fit_rows(qkvs, Np)
    W = q.shape[1]
    adjp = adj if adj.shape == (Np, Np) else jnp.pad(adj, ((0, Np - N), (0, Np - N)))
    if adjp.dtype != jnp.bfloat16:
        adjp = adjp.astype(jnp.bfloat16)
    nt = Np // tile
    out = pl.pallas_call(
        functools.partial(_graph_conv_kernel, num_heads=num_heads,
                          head_dim=head_dim, eps=eps),
        grid=(nt, nt),
        in_specs=[pl.BlockSpec((tile, W), lambda i, j: (i, 0)),      # dst rows (k, skip)
                  pl.BlockSpec((tile, W), lambda i, j: (j, 0)),      # src rows (q, v)
                  pl.BlockSpec((tile, tile), lambda i, j: (i, j)),   # adjacency (bf16)
                  pl.BlockSpec((4, HD), lambda i, j: (0, 0)),        # wa|wb|ln_g|ln_b
                  pl.BlockSpec((1, 2), lambda i, j: (0, 0))],        # gate_b | prelu
        out_specs=pl.BlockSpec((tile, HD), lambda i, j: (i, 0)),
        out_shape=jax.ShapeDtypeStruct((Np, HD), jnp.float32),
        scratch_shapes=[pltpu.VMEM((tile, num_heads), jnp.float32),
                        pltpu.VMEM((tile, num_heads), jnp.float32),
                        pltpu.VMEM((tile, HD), jnp.float32)],
        compiler_params=_cparams(("parallel", "arbitrary")),
    )(q, q, adjp, ew, es)
    return out[:N]


# =====================================================================
# Plain-JAX glue
# =====================================================================

def prelu(x, a):
    return jnp.where(x >= 0.0, x, a * x)


def fold_bn_after_linear(w, b, bn, eps=1e-5):
    s = bn["gamma"] / jnp.sqrt(bn["var"] + eps)
    return w * s[None, :], (b - bn["mean"]) * s + bn["beta"]


def fold_bn_before_linear(w, b, bn, eps=1e-5):
    s = bn["gamma"] / jnp.sqrt(bn["var"] + eps)
    t = bn["beta"] - bn["mean"] * s
    return w * s[:, None], b + t @ w


# =====================================================================
# Parameter initialization (deterministic, synthetic, pre-packed for the kernels)
# =====================================================================

class KeyGen:
    def __init__(self, key):
        self._key = key

    def __call__(self):
        self._key, sub = jax.random.split(self._key)
        return sub


def bn_params(c):
    return {"gamma": jnp.ones((c,), jnp.float32), "beta": jnp.zeros((c,), jnp.float32),
            "mean": jnp.zeros((c,), jnp.float32), "var": jnp.ones((c,), jnp.float32)}


def init_linear(kg, fin, fout):
    s = 1.0 / np.sqrt(fin)
    w = jax.random.uniform(kg(), (fin, fout), jnp.float32, -s, s)
    b = jax.random.uniform(kg(), (fout,), jnp.float32, -s, s)
    return w, b


def init_conv(kg, cout, cin_per_group, k):
    s = 1.0 / np.sqrt(cin_per_group * k)
    w = jax.random.uniform(kg(), (cout, cin_per_group, k), jnp.float32, -s, s)
    b = jax.random.uniform(kg(), (cout,), jnp.float32, -s, s)
    return w, b


def init_tabular(kg, input_dim, embed_dim, K=4, eps=1e-5):
    Din, ED = input_dim, embed_dim
    p = {"input_dim": Din, "embed_dim": ED, "K": K}
    hid = Din * ED * 2
    L1 = 2 * ED
    C0 = Din * K                 # conv1 / conv2 width (padded common width)
    C1 = Din * (K // 2)          # conv3..convs width
    p["c0"] = C0
    # dense1 with bn1 (eval) folded in; permute columns to channels-last (L, C) order
    bn1 = bn_params(Din)
    w1, b1 = init_linear(kg, Din, hid)
    w1, b1 = fold_bn_before_linear(w1, b1, bn1, eps)
    perm = (np.arange(L1)[:, None] + np.arange(Din)[None, :] * L1).reshape(-1)
    p["dense1"] = make_linear(w1[:, perm], b1[perm])
    # bn_cv1 scale/shift (applied inside the conv1 kernel)
    bn_cv1 = bn_params(Din)
    s = bn_cv1["gamma"] / jnp.sqrt(bn_cv1["var"] + eps)
    t = bn_cv1["beta"] - bn_cv1["mean"] * s
    p["bn_cv1_s"] = s.reshape(1, Din)
    p["bn_cv1_t"] = t.reshape(1, Din)
    # grouped conv1 (groups=Din) expanded to a dense (tap, Cin, Cout) weight
    wg, _ = init_conv(kg, Din * K, 1, 5)
    dense = np.zeros((5, Din, Din * K), np.float32)
    wg_np = np.asarray(wg)
    for o in range(Din * K):
        dense[:, o // K, o] = wg_np[o, 0, :]
    p["conv1_w"] = jnp.asarray(dense).astype(jnp.bfloat16)
    # conv2 .. conv10 stacked at a common padded width C0 (zero-padded channels)
    layer_defs = []
    layer_defs.append((*init_conv(kg, C0, C0, 3), bn_params(C0), True))     # conv2
    layer_defs.append((*init_conv(kg, C1, C0, 3), bn_params(C0), False))    # conv3
    for _ in range(6):
        layer_defs.append((*init_conv(kg, C1, C1, 3), bn_params(C1), True))
    layer_defs.append((*init_conv(kg, Din, C1, 3), bn_params(C1), False))   # conv10
    ws, bs, ss, ts, res = [], [], [], [], []
    for (w, b, bn, has_res) in layer_defs:
        cout, cin, _k = w.shape
        wt = np.zeros((3, C0, C0), np.float32)
        wt[:, :cin, :cout] = np.transpose(np.asarray(w), (2, 1, 0))
        bt = np.zeros((C0,), np.float32)
        bt[:cout] = np.asarray(b)
        sc = np.asarray(bn["gamma"] / jnp.sqrt(bn["var"] + eps))
        sh = np.asarray(bn["beta"] - bn["mean"] * (bn["gamma"] / jnp.sqrt(bn["var"] + eps)))
        s_pad = np.ones((C0,), np.float32)
        t_pad = np.zeros((C0,), np.float32)
        s_pad[:cin] = sc
        t_pad[:cin] = sh
        ws.append(wt)
        bs.append(bt.reshape(1, C0))
        ss.append(s_pad.reshape(1, C0))
        ts.append(t_pad.reshape(1, C0))
        res.append(bool(has_res))
    p["stack_w"] = jnp.asarray(np.stack(ws)).astype(jnp.bfloat16)      # (9,3,C0,C0)
    p["stack_b"] = jnp.asarray(np.stack(bs), jnp.float32)              # (9,1,C0)
    p["stack_s"] = jnp.asarray(np.stack(ss), jnp.float32)
    p["stack_t"] = jnp.asarray(np.stack(ts), jnp.float32)
    p["stack_res"] = tuple(res)
    return p


def init_trans_embedding(kg, in_feats, cat_vocab, neigh_cols, att_heads):
    F = in_feats
    p = {"cat_cols": list(cat_vocab.keys()), "neigh_cols": list(neigh_cols),
         "att_heads": att_heads}
    p["cat_table"] = {c: jax.random.normal(kg(), (v, F), jnp.float32)
                      for c, v in cat_vocab.items()}
    ws, bs = [], []
    for _ in cat_vocab:
        w, b = init_linear(kg, F, F)
        ws.append(w)
        bs.append(b)
    p["cat_w"] = jnp.stack(ws).astype(jnp.bfloat16)                    # (C, F, F)
    p["cat_b"] = jnp.stack(bs).reshape(len(ws), 1, F).astype(jnp.float32)
    p["nei_table"] = init_tabular(kg, len(neigh_cols), F)
    qw, qb = init_linear(kg, F, F)
    kw, kb = init_linear(kg, F, F)
    vw, vb = init_linear(kg, F, F)
    p["wqkv"] = jnp.concatenate([qw, kw, vw], axis=1).astype(jnp.bfloat16)
    p["bqkv"] = jnp.concatenate([qb, kb, vb], axis=0).reshape(1, 3 * F)
    fw, fb = init_linear(kg, F, F)
    p["wfin"] = fw.astype(jnp.bfloat16)
    p["bfin"] = fb.reshape(1, F)
    p["ln_g"] = jnp.ones((1, F), jnp.float32)
    p["ln_b"] = jnp.zeros((1, F), jnp.float32)
    mw, mb = init_linear(kg, F, 1)
    p["wmlp"] = mw.reshape(1, 1, F)
    p["bmlp"] = mb.reshape(1, 1)
    # TODO(synk): PosEncoding(time_pe) and label_table are built in the torch __init__
    # but never used in TransEmbedding.forward, so they are not materialized here.
    return p


def init_rgtan(kg, in_feats, hidden_dim, n_layers, n_classes, heads,
               cat_vocab, neigh_cols, nei_att_head):
    nei_dim = len(neigh_cols)
    feat_dim = in_feats + nei_dim
    hh = hidden_dim * heads[0]
    p = {"n_layers": n_layers, "hidden_dim": hidden_dim}
    p["n2v"] = init_trans_embedding(kg, in_feats, cat_vocab, neigh_cols, nei_att_head)
    lbl = jax.random.normal(kg(), (n_classes + 1, feat_dim), jnp.float32)
    p["label_emb"] = lbl.at[n_classes].set(0.0)                    # padding_idx
    l1w, l1b = init_linear(kg, feat_dim, hh)
    l2w, l2b = init_linear(kg, feat_dim, hh)
    bn3 = bn_params(hh)
    w12 = jnp.concatenate([l1w, l2w], axis=0)
    b12 = l1b + l2b
    w12, b12 = fold_bn_after_linear(w12, b12, bn3)
    p["l12"] = make_linear(w12, b12)
    p["l3_prelu"] = jnp.float32(0.25)
    l3w, l3b = init_linear(kg, hh, feat_dim)
    p["l3"] = make_linear(l3w, l3b)
    prelu_slope = jnp.full((1, 1), 0.25, jnp.float32)              # shared nn.PReLU()
    p["convs"] = []
    conv_in = feat_dim
    for l in range(n_layers):
        out = hidden_dim * heads[l]
        c = {"num_heads": int(heads[l]), "head_dim": int(hidden_dim)}
        qw, qb = init_linear(kg, conv_in, out)
        kw, kb = init_linear(kg, conv_in, out)
        vw, vb = init_linear(kg, conv_in, out)
        sw, sb = init_linear(kg, conv_in, out)
        c["qkvs"] = make_linear(jnp.concatenate([qw, kw, vw, sw], axis=1),
                                jnp.concatenate([qb, kb, vb, sb], axis=0))
        gw, gb = init_linear(kg, 3 * out, 1)
        w3 = gw.reshape(3, out)
        c["ew"] = jnp.stack([w3[0] + w3[2], w3[1] - w3[2],
                             jnp.ones((out,), jnp.float32),
                             jnp.zeros((out,), jnp.float32)], axis=0)
        c["es"] = jnp.concatenate([gb.reshape(1, 1), prelu_slope], axis=1)
        p["convs"].append(c)
        conv_in = out
    pp1w, pp1b = init_linear(kg, hh, hh)
    pp1w, pp1b = fold_bn_after_linear(pp1w, pp1b, bn_params(hh))
    p["pp1"] = make_linear(pp1w, pp1b)
    p["pp_prelu"] = jnp.float32(0.25)
    pp2w, pp2b = init_linear(kg, hh, n_classes)
    p["pp2"] = make_linear(pp2w, pp2b)
    return p


# =====================================================================
# Model forward
# =====================================================================

def trans_embedding_forward(p, cat_feats, neigh_feats):
    # TODO(synk): embedding-table gathers stay as XLA takes (data-dependent rows).
    cols = p["cat_cols"]
    emb = jnp.stack([p["cat_table"][c][cat_feats[c]] for c in cols], axis=0)  # (C,N,F)
    cat_output = pallas_cat_mlp(emb, p["cat_w"], p["cat_b"])                  # (N, F)
    neis = jnp.stack([neigh_feats[c] for c in p["neigh_cols"]], axis=0).T     # (N, S)
    xt = tabular_cnn_forward(p["nei_table"], neis)                            # (N, S, F)
    nei_out = pallas_neigh_attn(xt, p)                                        # (N, S)
    return cat_output, nei_out


def rgtan_forward(params, features, labels, cat_feats, neigh_feats, adjs):
    cat_h, nei_h = trans_embedding_forward(params["n2v"], cat_feats, neigh_feats)
    h = jnp.concatenate([features + cat_h, nei_h], axis=-1)        # (N, feat_dim)

    label_embed = params["label_emb"][labels]
    le_in = jnp.concatenate([h, label_embed], axis=-1)             # l1(h)+l2(lbl) fused
    le = pallas_linear(le_in, params["l12"])                       # BatchNorm folded
    le = prelu(le, params["l3_prelu"])
    le = pallas_linear(le, params["l3"])
    h = h + le

    for l in range(params["n_layers"]):
        c = params["convs"][l]
        qkvs = pallas_linear(h, c["qkvs"], keep_pad=True)          # fused q|k|v|skip
        h = pallas_graph_conv(qkvs, adjs[l], c["ew"], c["es"],
                              c["num_heads"], c["head_dim"])

    h = pallas_linear(h, params["pp1"])                            # BatchNorm folded
    h = prelu(h, params["pp_prelu"])
    logits = pallas_linear(h, params["pp2"])
    return logits


# =====================================================================
# Example run
# =====================================================================

if __name__ == "__main__":
    N = 8
    IN_FEATS = 16
    HIDDEN = 8
    HEADS = [4, 4]
    N_LAYERS = 2
    N_CLASSES = 2
    NEI_ATT_HEAD = 4
    CAT_VOCAB = {"card": 10, "merchant": 7}
    NEIGH_COLS = ["deg", "risk1", "risk2", "risk3"]

    kg = KeyGen(jax.random.PRNGKey(0))
    params = init_rgtan(kg, IN_FEATS, HIDDEN, N_LAYERS, N_CLASSES, HEADS,
                        CAT_VOCAB, NEIGH_COLS, NEI_ATT_HEAD)

    features = jax.random.normal(kg(), (N, IN_FEATS), jnp.float32)
    labels = jax.random.randint(kg(), (N,), 0, N_CLASSES + 1)      # N_CLASSES == pad idx
    cat_feats = {c: jax.random.randint(kg(), (N,), 0, v) for c, v in CAT_VOCAB.items()}
    neigh_feats = {c: jax.random.normal(kg(), (N,), jnp.float32) for c in NEIGH_COLS}

    adjs = []
    for _ in range(N_LAYERS):
        a = (jax.random.uniform(kg(), (N, N)) < 0.4).astype(jnp.float32)
        a = jnp.maximum(a, jnp.eye(N, dtype=jnp.float32))          # no 0-in-degree dst
        adjs.append(a.astype(jnp.bfloat16))                        # adjacency as bf16

    logits = rgtan_forward(params, features, labels, cat_feats, neigh_feats, adjs)
    logits = jax.block_until_ready(logits)
    assert logits.shape == (N, N_CLASSES)
    assert bool(jnp.all(jnp.isfinite(logits)))
    print("KERNEL_OK")
</pallas_src>

<mosaic_0001>
module attributes {stable_mosaic.version = 11 : i64} {
  func.func @_cat_mlp_kernel(%arg0: i32, %arg1: i32, %arg2: memref<1x8x16xf32, #tpu.memory_space<vmem>>, %arg3: memref<1x16x16xbf16, #tpu.memory_space<vmem>>, %arg4: memref<1x1x16xf32, #tpu.memory_space<vmem>>, %arg5: memref<8x16xf32, #tpu.memory_space<vmem>>) attributes {dimension_semantics = [#tpu.dimension_semantics<parallel>, #tpu.dimension_semantics<arbitrary>], iteration_bounds = array<i64: 1, 2>, scalar_prefetch = 0 : i64, scratch_operands = 0 : i64, tpu.core_type = #tpu.core_type<tc>, window_params = [{transform_indices = @transform_0, window_bounds = array<i64: 1, 8, 16>}, {transform_indices = @transform_1, window_bounds = array<i64: 1, 16, 16>}, {transform_indices = @transform_2, window_bounds = array<i64: 1, 1, 16>}, {transform_indices = @transform_3, window_bounds = array<i64: 8, 16>}]} {
    %c0_i32 = arith.constant 0 : i32
    %0 = arith.cmpi eq, %arg1, %c0_i32 : i32
    %1 = arith.extui %0 : i1 to i32
    %c0_i32_0 = arith.constant 0 : i32
    %2 = arith.cmpi ne, %1, %c0_i32_0 : i32
    scf.if %2 {
      %cst_13 = arith.constant 0.000000e+00 : f32
      %16 = vector.broadcast %cst_13 : f32 to vector<8x16xf32>
      %c0_14 = arith.constant 0 : index
      %c0_15 = arith.constant 0 : index
      %17 = vector.load %arg5[%c0_14, %c0_15] : memref<8x16xf32, #tpu.memory_space<vmem>>, vector<8x16xf32>
      tpu.vector_store %arg5[%c0_14, %c0_15], %16 {strides = array<i32>} : memref<8x16xf32, #tpu.memory_space<vmem>>, vector<8x16xf32>,
    } else {
    }
    %c0 = arith.constant 0 : index
    %c0_1 = arith.constant 0 : index
    %3 = vector.load %arg5[%c0, %c0_1] : memref<8x16xf32, #tpu.memory_space<vmem>>, vector<8x16xf32>
    %c0_2 = arith.constant 0 : index
    %c0_3 = arith.constant 0 : index
    %c0_4 = arith.constant 0 : index
    %4 = vector.load %arg2[%c0_2, %c0_3, %c0_4] : memref<1x8x16xf32, #tpu.memory_space<vmem>>, vector<1x8x16xf32>
    %5 = vector.shape_cast %4 : vector<1x8x16xf32> to vector<8x16xf32>
    %6 = arith.truncf %5 : vector<8x16xf32> to vector<8x16xbf16>
    %c0_5 = arith.constant 0 : index
    %c0_6 = arith.constant 0 : index
    %c0_7 = arith.constant 0 : index
    %7 = vector.load %arg3[%c0_5, %c0_6, %c0_7] : memref<1x16x16xbf16, #tpu.memory_space<vmem>>, vector<1x16x16xbf16>
    %8 = vector.shape_cast %7 : vector<1x16x16xbf16> to vector<16x16xbf16>
    %cst = arith.constant dense<0.000000e+00> : vector<8x16xf32>
    %9 = tpu.matmul %6, %8, %cst {dimension_numbers = #tpu.dot_dimension_numbers<[1], [0], [0], [1], [0, 0, 1, 1], [], []>} : vector<8x16xbf16>, vector<16x16xbf16>, vector<8x16xf32> -> vector<8x16xf32>
    %c0_8 = arith.constant 0 : index
    %c0_9 = arith.constant 0 : index
    %c0_10 = arith.constant 0 : index
    %10 = vector.load %arg4[%c0_8, %c0_9, %c0_10] : memref<1x1x16xf32, #tpu.memory_space<vmem>>, vector<1x1x16xf32>
    %11 = vector.shape_cast %10 : vector<1x1x16xf32> to vector<1x16xf32>
    %12 = vector.broadcast %11 : vector<1x16xf32> to vector<8x16xf32>
    %13 = arith.addf %9, %12 : vector<8x16xf32>
    %14 = arith.addf %3, %13 : vector<8x16xf32>
    %c0_11 = arith.constant 0 : index
    %c0_12 = arith.constant 0 : index
    %15 = vector.load %arg5[%c0_11, %c0_12] : memref<8x16xf32, #tpu.memory_space<vmem>>, vector<8x16xf32>
    tpu.vector_store %arg5[%c0_11, %c0_12], %14 {strides = array<i32>} : memref<8x16xf32, #tpu.memory_space<vmem>>, vector<8x16xf32>,
    return
  }
  func.func @transform_0(%arg0: i32, %arg1: i32) -> (i32, i32, i32) {
    %c0_i32 = arith.constant 0 : i32
    %c0_i32_0 = arith.constant 0 : i32
    return %arg1, %arg0, %c0_i32 : i32, i32, i32
  }
  func.func @transform_1(%arg0: i32, %arg1: i32) -> (i32, i32, i32) {
    %c0_i32 = arith.constant 0 : i32
    %c0_i32_0 = arith.constant 0 : i32
    %c0_i32_1 = arith.constant 0 : i32
    return %arg1, %c0_i32, %c0_i32_0 : i32, i32, i32
  }
  func.func @transform_2(%arg0: i32, %arg1: i32) -> (i32, i32, i32) {
    %c0_i32 = arith.constant 0 : i32
    %c0_i32_0 = arith.constant 0 : i32
    %c0_i32_1 = arith.constant 0 : i32
    return %arg1, %c0_i32, %c0_i32_0 : i32, i32, i32
  }
  func.func @transform_3(%arg0: i32, %arg1: i32) -> (i32, i32) {
    %c0_i32 = arith.constant 0 : i32
    %c0_i32_0 = arith.constant 0 : i32
    return %arg0, %c0_i32 : i32, i32
  }
}

</mosaic_0001>

<bundles_post_ra>
// kernel: tpu_custom_call.1
= control target key start
LH: loop header
LB: loop body
LE: loop exit
PB: predicated region body
PF: predicated region fallthrough
CT: control target
= control target key end

     0   :  { %8 = vsyncpa [#allocation3], 0  ;;  %s904_s0 = inlined_call_operand.hbm [shape: f32[2,8,16], index: 0, kind: input, shape index: {}]   ;;  %s905_s1 = inlined_call_operand.hbm [shape: bf16[2,16,16], index: 1, kind: input, shape index: {}]   ;;  %s906_s2 = inlined_call_operand.vmem [shape: f32[2,1,16], index: 2, kind: input, shape index: {}]   ;;  %s907_s3 = inlined_call_operand.hbm [shape: f32[8,16], index: 3, kind: output, shape index: {}]  }
   0x1   :  { %10 = vsyncpa [#allocation3 + $0x1], 0 }
   0x2   :  { %11 = vsyncpa [#allocation6], 0 }
   0x3   :  { %13 = vsyncpa [#allocation6 + $0x1], 0 }
   0x4   :  { %14 = vsyncpa [#allocation4], 0  ;;  %s697_s12 = smov 0   ;;  %s699_s13 = smov 0  }
   0x5   :  { %s701_s14 = smov 0   ;;  %s703_s15 = smov 0  }
   0x6   :  { %s705_s16 = smov 0   ;;  %s707_s17 = smov 0  }
   0x7 LB: > { %s422_s18 = sadd.s32 4294967295, %s667_s17   ;;  %s29_s19 = sadd.s32 1, %s663_s16  ;;  %s667_s17 = sphi %s707_s17, %s20_s17   ;;  %s663_s16 = sphi %s705_s16, %s919_s16   ;;  %s659_s15 = sphi %s703_s15, %s918_s15   ;;  %s655_s14 = sphi %s701_s14, %s917_s14   ;;  %s651_s13 = sphi %s699_s13, %s916_s13   ;;  %s647_s12 = sphi %s697_s12, %s915_s12  }
   0x8   : > { %p30_p0 = scmp.ge.s32.totalorder %s29_s19, 2  ;;  %s41_s20 = sadd.s32 1, %s655_s14 }
   0x9   : > { %p48_p1 = scmp.ne.s32.totalorder %s655_s14, %s651_s13  ;;  %p49_p2 = scmp.eq.s32.totalorder %s667_s17, 0 }
   0xa   : > { %s921_s19 = smov (%p30_p0, %s29_s19), 0  ;;  %p54_p4 = scmp.ne.s32.totalorder %s651_s13, %s647_s12 }
   0xb   : > { %p733_p3 = por %p49_p2, %p48_p1  ;;  %s36_s22 = ssub.s32 %s663_s16, %s921_s19 }
   0xc   : > { %p55_p5 = scmp.eq.s32.totalorder %s422_s18, 0  ;;  %p39_p6 = scmp.eq.s32.totalorder %s36_s22, 0 }
   0xd   : > { %p465_p8 = scmp.lt.s32.totalorder %s667_s17, 2  ;;  %s751_s25 = sand.u32 1, %s655_s14  }
   0xe   : > { %p742_p7 = por %p55_p5, %p54_p4  ;;  %s426_s26 = sshll.u32 %s663_s16, 7 }
   0xf   : > { %s748_s24 = scalar_select %p39_p6, %s655_s14, %s41_s20  }
  0x10   : > { %s910_s23 = scalar_select %p742_p7, 1, 0 }
  0x11   : > { %s425_s27 = sshll.u32 %s751_s25, 3  ;;  %s760_s30 = scalar_lea.hbm %s904_s0, %s426_s26 }
  0x12   : > { %s160_s4 = scalar_lea.vmem [#allocation2], %s425_s27  ;;  %p766_p9 = pnand %p465_p8, %p733_p3 }
  0x13   : > { %s168_s5 = sshll.u32 %s160_s4, 4  ;;  %s157_s7 = scalar_lea.sflag [#allocation3], %s751_s25  ;;  %s770_s5 = int_to_ptr.vmem [resolvable:$true] %s168_s5 }
  0x14   : > { %s523_s8 = scalar_lea.hbm %s760_s30, 128  ;;  %p525_p11 = pneg %p766_p9 }
  0x15   : > { %p524_p10 = scmp.ne.s32.totalorder %s760_s30, %s523_s8  ;;  %s528_s11 = scalar_lea.hbm %s904_s0, 256 }
  0x16   : > { %p529_p0 = scmp.lt.u32.totalorder %s760_s30, %s904_s0  ;;  %p530_p1 = scmp.lt.u32.totalorder %s528_s11, %s523_s8 }
  0x17   : > { %p526_p12 = pnand %p525_p11, %p524_p10  ;;  %p532_p3 = scmp.lt.u32.totalorder %s523_s8, %s760_s30 }
  0x18   : > { %p531_p2 = por %p530_p1, %p529_p0 }
  0x19   : > { %p527_p13 = pneg %p526_p12 }
  0x1a   : > { %p533_p4 = por %p532_p3, %p531_p2 }
  0x1c   : > { %p534_p5 = pnand %p533_p4, %p527_p13 }
  0x1e   : > { %537 = shalt.err (!%p534_p5)
}
  0x1f   : > { %s538_s21 = scalar_lea.vmem %s770_s5, 128  ;;  %s669_s22 = smov [#allocation2]  }
  0x20   : > { %p539_p6 = scmp.ne.s32.totalorder %s770_s5, %s538_s21  ;;  %s543_s28 = sshll.u32 %s669_s22, 4  ;;  %s544_s28 = int_to_ptr.vmem [resolvable:$false] %s543_s28 }
  0x21   : > { %s545_s29 = scalar_lea.vmem %s544_s28, 256  ;;  %p546_p12 = scmp.lt.s32.totalorder %s770_s5, %s544_s28 }
  0x22   : > { %p541_p8 = pnand %p539_p6, %p525_p11  ;;  %p547_p0 = scmp.lt.s32.totalorder %s545_s29, %s538_s21 }
  0x24   : > { %p542_p10 = pneg %p541_p8  ;;  %p548_p1 = por %p547_p0, %p546_p12 }
  0x26   : > { %p549_p2 = pnand %p548_p1, %p542_p10 }
  0x28   : > { %552 = shalt.err (!%p549_p2)
}
  0x29   : > { %461 = dma.hbm_to_vmem [thread:$0]  (!%p766_p9), %s760_s30, 128, %s770_s5, %s157_s7  }
  0x2a   : > { %s803_s9 = scalar_lea.hbm %s905_s1, %s426_s26  ;;  %s179_s10 = scalar_lea.vmem [#allocation5], %s425_s27 }
  0x2b   : > { %s186_s11 = sshll.u32 %s179_s10, 4  ;;  %p430_p13 = scmp.ge.s32.totalorder %s667_s17, 1  ;;  %s807_s11 = int_to_ptr.vmem [resolvable:$true] %s186_s11 }
  0x2c   : > { %p200_p3 = scmp.lt.s32.totalorder %s667_s17, 3  ;;  %s176_s30 = scalar_lea.sflag [#allocation6], %s751_s25 }
  0x2d   : > { %s553_s5 = scalar_lea.hbm %s803_s9, 128  ;;  %s558_s27 = scalar_lea.hbm %s905_s1, 256 }
  0x2e   : > { %p811_p4 = pnand %p430_p13, %p200_p3  ;;  %p554_p5 = scmp.ne.s32.totalorder %s803_s9, %s553_s5 }
  0x2f   : > { %p559_p10 = scmp.lt.u32.totalorder %s803_s9, %s905_s1  ;;  %p560_p12 = scmp.lt.u32.totalorder %s558_s27, %s553_s5 }
  0x30   : > { %p556_p6 = pnand %p554_p5, %p525_p11  ;;  %p562_p1 = scmp.lt.u32.totalorder %s553_s5, %s803_s9 }
  0x31   : > { %p561_p0 = por %p560_p12, %p559_p10 }
  0x32   : > { %p557_p8 = pneg %p556_p6 }
  0x33   : > { %p563_p2 = por %p562_p1, %p561_p0 }
  0x35   : > { %p564_p13 = pnand %p563_p2, %p557_p8 }
  0x37   : > { %567 = shalt.err (!%p564_p13)
}
  0x38   : > { %s568_s22 = scalar_lea.vmem %s807_s11, 128  ;;  %s670_s28 = smov [#allocation5]  }
  0x39   : > { %p569_p3 = scmp.ne.s32.totalorder %s807_s11, %s568_s22  ;;  %s573_s29 = sshll.u32 %s670_s28, 4  ;;  %s574_s29 = int_to_ptr.vmem [resolvable:$false] %s573_s29 }
  0x3a   : > { %s575_s4 = scalar_lea.vmem %s574_s29, 256  ;;  %p576_p7 = scmp.lt.s32.totalorder %s807_s11, %s574_s29 }
  0x3b   : > { %p571_p5 = pnand %p569_p3, %p525_p11  ;;  %p577_p10 = scmp.lt.s32.totalorder %s575_s4, %s568_s22 }
  0x3d   : > { %p572_p6 = pneg %p571_p5  ;;  %p578_p12 = por %p577_p10, %p576_p7 }
  0x3f   : > { %p579_p0 = pnand %p578_p12, %p572_p6 }
  0x41   : > { %582 = shalt.err (!%p579_p0)
}
  0x42   : > { %s671_s8 = smov 64   ;;  %s672_s10 = smov 4  }
  0x43   : > { %464 = dma.hbm_to_vmem [thread:$0]  (!%p766_p9), %s803_s9, 128, %s807_s11, %s176_s30, %s671_s8, %s671_s8, %s672_s10  }
  0x44   : > { %204 = sbr.rel (%p811_p4) target bundleno = 324 (0x144), region = 32  ;;  %s206_s5 = sand.u32 (!%p811_p4), 1, %s651_s13  }
  0x45   : > { %s431_s26 = sshll.u32 (!%p811_p4), %s206_s5, 3  ;;  %s207_s7 = scalar_lea.sflag (!%p811_p4), [#allocation3], %s206_s5 }
  0x46   : > { %s210_s27 = scalar_lea.vmem (!%p811_p4), [#allocation2], %s431_s26  ;;  %p913_p7 = scmp.ne.s32.totalorder (!%p811_p4), %s910_s23, 0 }
  0x4b   : > { %634 = dma.done.wait (%p913_p7), %s207_s7, 128  }
  0x4c   : > { %636 = vsyncadd (%p913_p7), %s207_s7, 4294967168  ;;  %s216_s20 = scalar_lea.sflag [#allocation6], %s206_s5  ;;  %s219_s21 = scalar_lea.vmem [#allocation5], %s431_s26 }
  0x4d   : > { %638 = dma.done.wait (%p913_p7), %s216_s20, 128  }
  0x4e   : > { %640 = vsyncadd (%p913_p7), %s216_s20, 4294967168  ;;  %p245_p9 = scmp.lt.s32.totalorder %s659_s15, 1  ;;  %p433_p11 = scmp.ne.s32.totalorder %s659_s15, 0 }
  0x4f   : > { %vm253_vm0 = vcmask (!%p433_p11), 130048   ;;  %v673_v0 = vmov (!%p433_p11), 0.0  }
  0x50   : > { %s246_s25 = scalar_select %p245_p9, %s659_s15, 1 }
  0x51   : > { %252 = sbr.rel (%p433_p11) target bundleno = 88 (0x58), region = 44  ;;  %254 = vst.msk [vmem:[#allocation7] sm:$0xff] (!%p433_p11), %vm253_vm0, %v673_v0 }
  0x52   : > { %s247_s11 = scalar_lea.vmem %s906_s2, %s246_s25 }
  0x58 PF: > { %v522_v1 = vld [vmem:[%s219_s21] sm:$0xff]   ;;  %v674_v2 = vmov 0.0   ;;  %v256_v3 = vld [vmem:[%s210_s27] sm:$0xff]  ;;  %vm675_vm1 = vmmov 0   ;;  %vm273_vm2 = vcmask 130048   ;;  %s676_s15 = smov [#allocation7]  }
  0x59   : > { %444 = vmatprep.subr.bf16.mxu0 %v674_v2  ;;  %446 = vmatprep.mubr.msk.bf16.mxu0 %vm675_vm1, %v674_v2  ;;  %v257_v4 = vpack.c.bf16 %v256_v3, %v256_v3  ;;  %v434_v5 = vld [vmem:[%s247_s11] ss:$0 sm:$0xff]  ;;  %s328_s23 = sshll.u32 %s676_s15, 4  ;;  %p860_p4 = scmp.eq.s32.totalorder %s422_s18, 1  ;;  %s329_s23 = int_to_ptr.vmem [resolvable:$true] %s328_s23 }
  0x5a   : > { %445 = vmatpush3.bf16.msra.mxu0 %v522_v1  ;;  %v255_v6 = vld [vmem:[#allocation7] sm:$0xff]  ;;  %s583_s30 = scalar_lea.vmem %s329_s23, 128  ;;  %p590_p13 = scmp.lt.s32.totalorder %s329_s23, %s329_s23 }
  0x5b   : > { %p584_p8 = scmp.ne.s32.totalorder %s329_s23, %s583_s30  ;;  %p591_p3 = scmp.lt.s32.totalorder %s583_s30, %s583_s30 }
  0x5d   : > { %447 = vmatmul.mubr.msk.bf16.vlgmr.msra.gmra.mrb[0].mxu0 %vm273_vm2, %v257_v4  ;;  %p585_p1 = pnand %p584_p8, %p860_p4  ;;  %p592_p5 = por %p591_p3, %p590_p13 }
  0x5f   : > { %p586_p2 = pneg %p585_p1 }
  0x61   : > { %p593_p6 = pnand %p592_p5, %p586_p2 }
 0x130   : > { %v311_v7 = vpop.f32.mrb[0].mxu0 }
 0x131   : > { %v312_v8 = vadd.f32 %v434_v5, %v311_v7  ;;  %v448_v9 = vpop.f32.mrb[1].mxu0 }
 0x132   : > { %v314_v10 = vpop.f32.mrb[2].mxu0 }
 0x133   : > { %v317_v11 = vadd.f32 %v312_v8, %v255_v6  ;;  %v449_v12 = vpop.f32.mrb[3].mxu0 }
 0x135   : > { %318 = vst.msk [vmem:[#allocation7] sm:$0xff] %vm273_vm2, %v317_v11 }
 0x136   : > { %596 = shalt.err (!%p593_p6)
}
 0x137   : > { %s597_s28 = scalar_lea.hbm %s907_s3, 128 }
 0x138   : > { %p598_p10 = scmp.ne.s32.totalorder %s907_s3, %s597_s28  ;;  %p603_p7 = scmp.lt.u32.totalorder %s597_s28, %s907_s3 }
 0x13a   : > { %p599_p12 = pnand %p598_p10, %p860_p4 }
 0x13c   : > { %p600_p0 = pneg %p599_p12 }
 0x13e   : > { %p605_p9 = pnand %p603_p7, %p600_p0 }
 0x140   : > { %608 = shalt.err (!%p605_p9)
}
 0x141   : > { %455 = dma.vmem_to_hbm [thread:$0]  (%p860_p4), %s329_s23, 128, %s907_s3, [#allocation4]  }
 0x142   : > { %642 = dma.done.wait (%p860_p4), [#allocation4], 128  }
 0x143   : > { %644 = vsyncadd (%p860_p4), [#allocation4], 4294967168 }
 0x144 PF: > { %s20_s17 = sadd.s32 1, %s667_s17   ;;  %s915_s12 = smov %s651_s13 }
 0x145   : > { %p17_p11 = scmp.ge.s32.totalorder %s20_s17, 4   ;;  %s916_s13 = smov %s655_s14 }
 0x146   : > { %s917_s14 = smov %s748_s24  ;;  %s918_s15 = smov %s663_s16 }
 0x147   : > { %s919_s16 = smov %s921_s19  ;;  %19 = sbr.rel (!%p17_p11) target bundleno = 7 (0x7), region = 90 }
 0x14e   :  { %341 = vsyncpa [#allocation3], 1 }
 0x14f   :  { %343 = vsyncpa [#allocation3 + $0x1], 1 }
 0x150   :  { %344 = vsyncpa [#allocation6], 1 }
 0x151   :  { %346 = vsyncpa [#allocation6 + $0x1], 1 }
 0x152   :  { %347 = vsyncpa [#allocation4], 1 }
 0x153   :  { %349 = vsyncpa [#allocation4 + $0x1], 1 }

</bundles_post_ra>
